<compile_context>
chip_gen: v5e
topology: v5e:2x2
jax: 0.10.0
libtpu: 0.0.40
codegen_flags: <defaults>
</compile_context>

<pallas_src>
import math
from functools import partial

import jax
import jax.numpy as jnp
from jax.experimental import pallas as pl
from jax.experimental.pallas import tpu as pltpu


def _round_up(a: int, b: int) -> int:
    return ((a + b - 1) // b) * b


def _make_lif_seq_kernel(beta: float, factor: float):
    def kernel(x_ref, mem0_ref, spk0_ref,        # inputs
               spk_seq_ref, mem_out_ref,         # outputs
               mem_sc, spk_sc):                  # VMEM state scratch (persistent across t)
        t = pl.program_id(1)

        # Load the initial state into VMEM once per feature tile.
        @pl.when(t == 0)
        def _init():
            mem_sc[...] = mem0_ref[...]
            spk_sc[...] = spk0_ref[...]

        mem = mem_sc[...]
        prev_spikes = spk_sc[...]

        # spike_fn forward: (mem - 1 > 0).float()   -- thresholds the OLD membrane.
        out_spikes = (mem - 1.0 > 0.0).astype(jnp.float32)
        # NoResetNeuron update, then LIF subtraction of the PREVIOUS step's spikes.
        new_mem = beta * mem + factor * x_ref[...] - prev_spikes

        spk_seq_ref[...] = out_spikes        # streamed spike train (per-step output)
        mem_sc[...] = new_mem                # state stays resident in VMEM
        spk_sc[...] = out_spikes
        mem_out_ref[...] = new_mem           # resident output block; written back once per tile

    return kernel


@partial(jax.jit, static_argnames=("beta", "factor", "tile_n"))
def lif_neuron_sequence(x_seq, mem0, spikes0, *, beta: float, factor: float, tile_n: int = 512):
    """Run T fused LIFNeuron steps in a single pallas_call.

    x_seq:   [T, B, N] float32
    mem0:    [B, N]    float32   (h['mem'])
    spikes0: [B, N]    float32   (h['spikes'])

    Returns (spikes_seq [T,B,N], mem_final [B,N], spikes_final [B,N]); per-step
    semantics match LIFNeuron.forward exactly.
    """
    T, B, N = x_seq.shape
    assert mem0.shape == (B, N) and spikes0.shape == (B, N)

    # Lane-dense tiling: tile width is a multiple of 128; pad N up to a multiple of it.
    tn = min(_round_up(int(tile_n), 128), _round_up(N, 128))
    Np = _round_up(N, tn)
    if Np != N:
        x_seq = jnp.pad(x_seq, ((0, 0), (0, 0), (0, Np - N)))
        mem0 = jnp.pad(mem0, ((0, 0), (0, Np - N)))
        spikes0 = jnp.pad(spikes0, ((0, 0), (0, Np - N)))
        # Padded lanes stay exactly 0 through the recurrence (0*beta + 0*factor - 0).

    grid = (Np // tn, T)                     # (feature tiles, time) — time innermost

    x_spec = pl.BlockSpec((None, B, tn), lambda i, t: (t, 0, i))
    state_spec = pl.BlockSpec((B, tn), lambda i, t: (0, i))
    spk_seq_spec = pl.BlockSpec((None, B, tn), lambda i, t: (t, 0, i))

    spikes_seq, mem_final = pl.pallas_call(
        _make_lif_seq_kernel(float(beta), float(factor)),
        grid=grid,
        in_specs=[x_spec, state_spec, state_spec],
        out_specs=(spk_seq_spec, state_spec),
        out_shape=(
            jax.ShapeDtypeStruct((T, B, Np), jnp.float32),
            jax.ShapeDtypeStruct((B, Np), jnp.float32),
        ),
        scratch_shapes=[
            pltpu.VMEM((B, tn), jnp.float32),     # membrane state (resident over t)
            pltpu.VMEM((B, tn), jnp.float32),     # previous spikes (resident over t)
        ],
        input_output_aliases={1: 1},              # mem0 -> mem_final (in-place state update)
        compiler_params=pltpu.CompilerParams(
            dimension_semantics=("parallel", "arbitrary"),
        ),
    )(x_seq, mem0, spikes0)

    if Np != N:
        spikes_seq = spikes_seq[..., :N]
        mem_final = mem_final[..., :N]
    return spikes_seq, mem_final, spikes_seq[-1]


def lif_neuron_forward(x, mem, spikes, *, beta: float, factor: float):
    """Single LIFNeuron.forward step (T == 1 specialization of the fused kernel)."""
    spikes_seq, new_mem, _ = lif_neuron_sequence(
        x[None], mem, spikes, beta=beta, factor=factor)
    out_spikes = spikes_seq[0]
    return out_spikes, new_mem, out_spikes


def get_initial_state(initial_mem, batch_size):
    """Mirror NoResetNeuron.get_initial_state (plain-JAX glue)."""
    mem = jnp.broadcast_to(initial_mem[None, :], (batch_size, initial_mem.shape[0]))
    spikes = (mem - 1.0 > 0.0).astype(jnp.float32)
    return mem, spikes


if __name__ == "__main__":
    # Module hyper-params (deterministic, chosen in-script).
    SIZE = 32
    BATCH = 2
    STEPS = 8
    BETA = 0.9
    FACTOR = math.sqrt(1.0 - BETA ** 2)   # params['1-beta'] == 'improved'

    # Parameter init (nn.Parameter(torch.zeros([size]))).
    initial_mem = jnp.zeros((SIZE,), dtype=jnp.float32)

    key = jax.random.PRNGKey(0)
    kx, km = jax.random.split(key)
    x_seq = jax.random.normal(kx, (STEPS, BATCH, SIZE), dtype=jnp.float32)

    # State: perturb the membrane so both the threshold and the reset path are exercised.
    mem0, _ = get_initial_state(initial_mem, BATCH)
    mem0 = mem0 + jax.random.uniform(km, (BATCH, SIZE), dtype=jnp.float32, minval=0.0, maxval=2.0)
    spikes0 = (mem0 - 1.0 > 0.0).astype(jnp.float32)

    # Fused multi-step kernel.
    spikes_seq, mem_final, spikes_final = lif_neuron_sequence(
        x_seq, mem0, spikes0, beta=BETA, factor=FACTOR)
    jax.block_until_ready((spikes_seq, mem_final, spikes_final))

    # Single-step wrapper (matches LIFNeuron.forward signature shape-wise).
    out1, new_mem1, new_spk1 = lif_neuron_forward(x_seq[0], mem0, spikes0, beta=BETA, factor=FACTOR)
    jax.block_until_ready((out1, new_mem1, new_spk1))

    # Pure-JAX reference (same math as the PyTorch forward, applied per step).
    def ref_step(carry, x):
        mem, spk = carry
        out = (mem - 1.0 > 0.0).astype(jnp.float32)
        new_mem = BETA * mem + FACTOR * x - spk
        return (new_mem, out), out

    (ref_mem_final, ref_spk_final), ref_spk_seq = jax.lax.scan(ref_step, (mem0, spikes0), x_seq)

    assert jnp.allclose(spikes_seq, ref_spk_seq)
    assert jnp.allclose(mem_final, ref_mem_final, atol=1e-6, rtol=1e-6)
    assert jnp.allclose(spikes_final, ref_spk_final)
    assert jnp.allclose(out1, ref_spk_seq[0])
    assert jnp.allclose(new_mem1, BETA * mem0 + FACTOR * x_seq[0] - spikes0, atol=1e-6)
    assert jnp.allclose(new_spk1, ref_spk_seq[0])

    print("KERNEL_OK")
</pallas_src>

<mosaic_0001>
module attributes {stable_mosaic.version = 11 : i64} {
  func.func @kernel(%arg0: i32, %arg1: i32, %arg2: memref<1x2x128xf32, #tpu.memory_space<vmem>>, %arg3: memref<2x128xf32, #tpu.memory_space<vmem>>, %arg4: memref<2x128xf32, #tpu.memory_space<vmem>>, %arg5: memref<1x2x128xf32, #tpu.memory_space<vmem>>, %arg6: memref<2x128xf32, #tpu.memory_space<vmem>>, %arg7: memref<2x128xf32, #tpu.memory_space<vmem>>, %arg8: memref<2x128xf32, #tpu.memory_space<vmem>>) attributes {dimension_semantics = [#tpu.dimension_semantics<parallel>, #tpu.dimension_semantics<arbitrary>], iteration_bounds = array<i64: 1, 8>, scalar_prefetch = 0 : i64, scratch_operands = 2 : i64, tpu.core_type = #tpu.core_type<tc>, window_params = [{transform_indices = @transform_0, window_bounds = array<i64: 1, 2, 128>}, {transform_indices = @transform_1, window_bounds = array<i64: 2, 128>}, {transform_indices = @transform_2, window_bounds = array<i64: 2, 128>}, {transform_indices = @transform_3, window_bounds = array<i64: 1, 2, 128>}, {transform_indices = @transform_4, window_bounds = array<i64: 2, 128>}]} {
    %c0_i32 = arith.constant 0 : i32
    %0 = arith.cmpi eq, %arg1, %c0_i32 : i32
    %1 = arith.extui %0 : i1 to i32
    %c0_i32_0 = arith.constant 0 : i32
    %2 = arith.cmpi ne, %1, %c0_i32_0 : i32
    scf.if %2 {
      %c0_19 = arith.constant 0 : index
      %c0_20 = arith.constant 0 : index
      %25 = vector.load %arg3[%c0_19, %c0_20] : memref<2x128xf32, #tpu.memory_space<vmem>>, vector<2x128xf32>
      %c0_21 = arith.constant 0 : index
      %c0_22 = arith.constant 0 : index
      %26 = vector.load %arg7[%c0_21, %c0_22] : memref<2x128xf32, #tpu.memory_space<vmem>>, vector<2x128xf32>
      tpu.vector_store %arg7[%c0_21, %c0_22], %25 {strides = array<i32>} : memref<2x128xf32, #tpu.memory_space<vmem>>, vector<2x128xf32>,
      %c0_23 = arith.constant 0 : index
      %c0_24 = arith.constant 0 : index
      %27 = vector.load %arg4[%c0_23, %c0_24] : memref<2x128xf32, #tpu.memory_space<vmem>>, vector<2x128xf32>
      %c0_25 = arith.constant 0 : index
      %c0_26 = arith.constant 0 : index
      %28 = vector.load %arg8[%c0_25, %c0_26] : memref<2x128xf32, #tpu.memory_space<vmem>>, vector<2x128xf32>
      tpu.vector_store %arg8[%c0_25, %c0_26], %27 {strides = array<i32>} : memref<2x128xf32, #tpu.memory_space<vmem>>, vector<2x128xf32>,
    } else {
    }
    %c0 = arith.constant 0 : index
    %c0_1 = arith.constant 0 : index
    %3 = vector.load %arg7[%c0, %c0_1] : memref<2x128xf32, #tpu.memory_space<vmem>>, vector<2x128xf32>
    %c0_2 = arith.constant 0 : index
    %c0_3 = arith.constant 0 : index
    %4 = vector.load %arg8[%c0_2, %c0_3] : memref<2x128xf32, #tpu.memory_space<vmem>>, vector<2x128xf32>
    %cst = arith.constant 1.000000e+00 : f32
    %5 = vector.broadcast %cst : f32 to vector<2x128xf32>
    %6 = arith.subf %3, %5 : vector<2x128xf32>
    %cst_4 = arith.constant 0.000000e+00 : f32
    %7 = vector.broadcast %cst_4 : f32 to vector<2x128xf32>
    %8 = arith.cmpf ogt, %6, %7 : vector<2x128xf32>
    %9 = arith.extui %8 : vector<2x128xi1> to vector<2x128xi32>
    %10 = arith.sitofp %9 : vector<2x128xi32> to vector<2x128xf32>
    %cst_5 = arith.constant 0.899999976 : f32
    %11 = vector.broadcast %cst_5 : f32 to vector<2x128xf32>
    %12 = arith.mulf %11, %3 : vector<2x128xf32>
    %c0_6 = arith.constant 0 : index
    %c0_7 = arith.constant 0 : index
    %c0_8 = arith.constant 0 : index
    %13 = vector.load %arg2[%c0_6, %c0_7, %c0_8] : memref<1x2x128xf32, #tpu.memory_space<vmem>>, vector<1x2x128xf32>
    %14 = vector.shape_cast %13 : vector<1x2x128xf32> to vector<2x128xf32>
    %cst_9 = arith.constant 0.4358899 : f32
    %15 = vector.broadcast %cst_9 : f32 to vector<2x128xf32>
    %16 = arith.mulf %15, %14 : vector<2x128xf32>
    %17 = arith.addf %12, %16 : vector<2x128xf32>
    %18 = arith.subf %17, %4 : vector<2x128xf32>
    %c0_10 = arith.constant 0 : index
    %c0_11 = arith.constant 0 : index
    %c0_12 = arith.constant 0 : index
    %19 = vector.load %arg5[%c0_10, %c0_11, %c0_12] : memref<1x2x128xf32, #tpu.memory_space<vmem>>, vector<1x2x128xf32>
    %20 = vector.shape_cast %19 : vector<1x2x128xf32> to vector<2x128xf32>
    %21 = vector.shape_cast %10 : vector<2x128xf32> to vector<1x2x128xf32>
    tpu.vector_store %arg5[%c0_10, %c0_11, %c0_12], %21 {strides = array<i32>} : memref<1x2x128xf32, #tpu.memory_space<vmem>>, vector<1x2x128xf32>,
    %c0_13 = arith.constant 0 : index
    %c0_14 = arith.constant 0 : index
    %22 = vector.load %arg7[%c0_13, %c0_14] : memref<2x128xf32, #tpu.memory_space<vmem>>, vector<2x128xf32>
    tpu.vector_store %arg7[%c0_13, %c0_14], %18 {strides = array<i32>} : memref<2x128xf32, #tpu.memory_space<vmem>>, vector<2x128xf32>,
    %c0_15 = arith.constant 0 : index
    %c0_16 = arith.constant 0 : index
    %23 = vector.load %arg8[%c0_15, %c0_16] : memref<2x128xf32, #tpu.memory_space<vmem>>, vector<2x128xf32>
    tpu.vector_store %arg8[%c0_15, %c0_16], %10 {strides = array<i32>} : memref<2x128xf32, #tpu.memory_space<vmem>>, vector<2x128xf32>,
    %c0_17 = arith.constant 0 : index
    %c0_18 = arith.constant 0 : index
    %24 = vector.load %arg6[%c0_17, %c0_18] : memref<2x128xf32, #tpu.memory_space<vmem>>, vector<2x128xf32>
    tpu.vector_store %arg6[%c0_17, %c0_18], %18 {strides = array<i32>} : memref<2x128xf32, #tpu.memory_space<vmem>>, vector<2x128xf32>,
    return
  }
  func.func @transform_0(%arg0: i32, %arg1: i32) -> (i32, i32, i32) {
    %c0_i32 = arith.constant 0 : i32
    %c0_i32_0 = arith.constant 0 : i32
    return %arg1, %c0_i32, %arg0 : i32, i32, i32
  }
  func.func @transform_1(%arg0: i32, %arg1: i32) -> (i32, i32) {
    %c0_i32 = arith.constant 0 : i32
    %c0_i32_0 = arith.constant 0 : i32
    return %c0_i32, %arg0 : i32, i32
  }
  func.func @transform_2(%arg0: i32, %arg1: i32) -> (i32, i32) {
    %c0_i32 = arith.constant 0 : i32
    %c0_i32_0 = arith.constant 0 : i32
    return %c0_i32, %arg0 : i32, i32
  }
  func.func @transform_3(%arg0: i32, %arg1: i32) -> (i32, i32, i32) {
    %c0_i32 = arith.constant 0 : i32
    %c0_i32_0 = arith.constant 0 : i32
    return %arg1, %c0_i32, %arg0 : i32, i32, i32
  }
  func.func @transform_4(%arg0: i32, %arg1: i32) -> (i32, i32) {
    %c0_i32 = arith.constant 0 : i32
    %c0_i32_0 = arith.constant 0 : i32
    return %c0_i32, %arg0 : i32, i32
  }
}

</mosaic_0001>

<bundles_post_ra>
// kernel: lif_neuron_sequence.1
= control target key start
LH: loop header
LB: loop body
LE: loop exit
PB: predicated region body
PF: predicated region fallthrough
CT: control target
= control target key end

     0   :  { %s515_s15 = smov 0   ;;  %s517_s16 = smov 0   ;;  %s557_s0 = inlined_call_operand.vmem [shape: f32[8,2,128], index: 0, kind: input, shape index: {}]   ;;  %s558_s1 = inlined_call_operand.vmem [shape: f32[2,128], index: 1, kind: input, shape index: {}, may-alias: {1,4}]   ;;  %s559_s2 = inlined_call_operand.vmem [shape: f32[2,128], index: 2, kind: input, shape index: {}]   ;;  %s560_s3 = inlined_call_operand.vmem [shape: f32[8,2,128], index: 3, kind: output, shape index: {0}]   ;;  %s561_s4 = inlined_call_operand.vmem [shape: f32[2,128], index: 4, kind: output, shape index: {1}, may-alias: {1,4}]  }
   0x1   :  { %s519_s17 = smov 0  }
   0x2 LB: > { %s24_s18 = sadd.s32 1, %s483_s16  ;;  %p431_p0 = scmp.ge.s32.totalorder %s487_s17, 1  ;;  %s487_s17 = sphi %s519_s17, %s15_s17   ;;  %s483_s16 = sphi %s517_s16, %s563_s16   ;;  %s479_s15 = sphi %s515_s15, %s562_s15  }
   0x3   : > { %p25_p1 = scmp.ge.s32.totalorder %s24_s18, 8  ;;  %p201_p2 = scmp.lt.s32.totalorder %s487_s17, 9 }
   0x5   : > { %s565_s18 = smov (%p25_p1, %s24_s18), 0  ;;  %p202_p3 = pnand %p431_p0, %p201_p2 }
   0x6   : > { %p243_p4 = scmp.lt.s32.totalorder (!%p202_p3), %s479_s15, 7  ;;  %p434_p5 = scmp.ne.s32.totalorder (!%p202_p3), %s479_s15, 0 }
   0x7   : > { %205 = sbr.rel (%p202_p3) target bundleno = 35 (0x23), region = 32 }
   0xc   : > { %s244_s19 = scalar_select %p243_p4, %s479_s15, 7 }
   0xd   : > { %272 = sbr.rel (%p434_p5) target bundleno = 21 (0x15), region = 36 }
   0xe   : > { %s432_s20 = sshll.u32 %s244_s19, 1 }
   0xf   : > { %s249_s23 = scalar_lea.vmem %s557_s0, %s432_s20  ;;  %s264_s26 = scalar_lea.vmem %s560_s3, %s432_s20 }
  0x12   : > { %v273_v0 = vld [vmem:[%s558_s1] sm:$0x3] }
  0x13   : > { %v275_v1 = vld [vmem:[%s559_s2] sm:$0x3]  ;;  %274 = vst [vmem:[#allocation2] sm:$0x3] %v273_v0 }
  0x14   : > { %276 = vst [vmem:[#allocation3] sm:$0x3] %v275_v1 }
  0x15 PF: > { %v284_v5 = vld [vmem:[%s249_s23] sm:$0x3]  ;;  %v489_v8 = vmov 0.0  }
  0x16   : > { %v285_v6 = vmul.f32 0.4358899, %v284_v5 }
  0x1a   : > { %v277_v2 = vld [vmem:[#allocation2] sm:$0x3] }
  0x1b   : > { %v435_v3 = vadd.f32 -1.0, %v277_v2  ;;  %v283_v4 = vmul.f32 0.9, %v277_v2  ;;  %v278_v7 = vld [vmem:[#allocation3] sm:$0x3] }
  0x1d   : > { %vm280_vm0 = vcmp.gt.f32.partialorder %v435_v3, 0.0  ;;  %v286_v10 = vadd.f32 %v285_v6, %v283_v4 }
  0x1e   : > { %v436_v9 = vsel %vm280_vm0, 1.0, %v489_v8 }
  0x1f   : > { %288 = vst [vmem:[%s264_s26] sm:$0x3] %v436_v9  ;;  %v287_v11 = vsub.f32 %v286_v10, %v278_v7 }
  0x20   : > { %290 = vst [vmem:[#allocation3] sm:$0x3] %v436_v9 }
  0x21   : > { %289 = vst [vmem:[#allocation2] sm:$0x3] %v287_v11 }
  0x22   : > { %291 = vst [vmem:[%s561_s4] sm:$0x3] %v287_v11 }
  0x23 PF: > { %s15_s17 = sadd.s32 1, %s487_s17   ;;  %s562_s15 = smov %s483_s16 }
  0x24   : > { %p12_p6 = scmp.ge.s32.totalorder %s15_s17, 10   ;;  %s563_s16 = smov %s565_s18 }
  0x26   :  { %14 = sbr.rel (!%p12_p6) target bundleno = 2 (0x2), region = 84 }

</bundles_post_ra>
